<compile_context>
chip_gen: v7x
topology: tpu7x:2x2x1
jax: 0.10.0
libtpu: 0.0.40
codegen_flags: <defaults>
</compile_context>

<pallas_src>
import functools

import jax
import jax.numpy as jnp
import numpy as np
from jax import lax
from jax.experimental import pallas as pl
from jax.experimental.pallas import tpu as pltpu


def _round_up(n, m):
    return ((n + m - 1) // m) * m


def _grid_embedding_kernel(idx_ref, table_ref, out_ref):
    """One batch tile of the embedding gather, done as a one-hot MXU matmul.

    idx_ref   : VMEM int32 [TB, 1]         flat grid indices for this tile
    table_ref : VMEM f32   [V_pad, E_pad]  whole (padded) embedding table, resident
    out_ref   : VMEM f32   [TB, E_pad]     gathered rows for this tile
    """
    tb = out_ref.shape[0]
    v_pad = table_ref.shape[0]
    # Lane-broadcast the [TB, 1] index column against a lane iota -> [TB, V_pad].
    one_hot = (idx_ref[...] == lax.broadcasted_iota(jnp.int32, (tb, v_pad), 1)
               ).astype(table_ref.dtype)
    # Gather = one_hot @ table on the MXU; HIGHEST keeps the f32 path near-exact.
    out_ref[...] = jnp.dot(
        one_hot,
        table_ref[...],
        preferred_element_type=jnp.float32,
        precision=lax.Precision.HIGHEST,
    ).astype(out_ref.dtype)


def grid_embedding_forward(table, x, grid_size, *, block_b=256):
    """table: [grid_size**2, embed_dim] f32, x: [B, 2] f32 in [0, 1) -> [B, embed_dim]."""
    if x.ndim != 2 or x.shape[1] != 2:
        raise ValueError(f"x must have shape [B, 2], got {x.shape}")
    V, E = table.shape
    if V != grid_size * grid_size:
        raise ValueError("table must have grid_size**2 rows")
    B = x.shape[0]

    # ---- index computation: (x * grid_size).long(); row*G + col -------------------
    # astype(int32) truncates toward zero, matching torch .long().
    xg = (x * grid_size).astype(jnp.int32)                        # [B, 2]
    idx = xg[:, 0] * grid_size + xg[:, 1]                         # [B] int32
    # PyTorch raises on out-of-range indices; we clamp so the gather stays in-bounds.
    idx = jnp.clip(idx, 0, V - 1)

    # ---- padding for lane-dense stores and MXU-aligned one-hot --------------------
    e_pad = _round_up(E, 128)            # lane-dense output (unmasked vst)
    v_pad = _round_up(V, 256)            # 256-wide MXU feed (v6e / v7x); ok on v5e
    tb = min(block_b, _round_up(B, 8))   # f32 sublane granularity = 8
    b_pad = _round_up(B, tb)
    num_blocks = b_pad // tb

    table_p = table
    if (v_pad, e_pad) != (V, E):
        table_p = jnp.pad(table, ((0, v_pad - V), (0, e_pad - E)))
    idx_col = jnp.pad(idx, (0, b_pad - B)).reshape(b_pad, 1)      # padded rows -> row 0

    # ---- VMEM budget (explicit so it also fits v7x's 64 MiB per TC) ---------------
    itemsize = jnp.dtype(table.dtype).itemsize
    table_bytes = v_pad * e_pad * itemsize
    out_tile_bytes = tb * e_pad * itemsize
    idx_tile_bytes = tb * 128 * 4                 # (TB,1) i32 tile, lane-padded
    onehot_bytes = tb * v_pad * 4                 # in-kernel intermediate
    vmem_limit = int(2 * table_bytes              # resident table (pipeline buffers)
                     + 2 * out_tile_bytes + 2 * idx_tile_bytes
                     + onehot_bytes + (4 << 20))  # headroom
    # TODO(synk): for tables too large for VMEM residency (esp. v7x 64 MiB/TC),
    # switch to an HBM-resident table (memory_space=pl.ANY) with a manual
    # make_async_copy row-gather ring buffer, or bf16 residency.

    out = pl.pallas_call(
        _grid_embedding_kernel,
        grid=(num_blocks,),
        in_specs=[
            pl.BlockSpec((tb, 1), lambda i: (i, 0)),          # per-tile indices
            pl.BlockSpec((v_pad, e_pad), lambda i: (0, 0)),   # whole table, fetched once
        ],
        out_specs=pl.BlockSpec((tb, e_pad), lambda i: (i, 0)),
        out_shape=jax.ShapeDtypeStruct((b_pad, e_pad), table.dtype),
        compiler_params=pltpu.CompilerParams(
            dimension_semantics=("parallel",),                # batch tiles across TCs
            vmem_limit_bytes=vmem_limit,
        ),
        cost_estimate=pl.CostEstimate(
            flops=2 * b_pad * v_pad * e_pad,
            transcendentals=0,
            bytes_accessed=int(table_bytes + b_pad * e_pad * itemsize + b_pad * 4),
        ),
    )(idx_col, table_p)
    return out[:B, :E]


def grid_embedding_reference(table, x, grid_size):
    """Pure-JAX reference mirroring the PyTorch forward."""
    xg = (x * grid_size).astype(jnp.int32)
    idx = xg[:, 0] * grid_size + xg[:, 1]
    idx = jnp.clip(idx, 0, table.shape[0] - 1)
    return table[idx]


if __name__ == "__main__":
    key = jax.random.PRNGKey(0)
    k_t1, k_x1, k_t2, k_x2 = jax.random.split(key, 4)

    # Case 1: grid_size=16 (V=256), embed_dim=128 (already lane-dense), B=64.
    # block_b=32 -> grid=(2,): exercises the multi-tile path.
    grid_size, embed_dim, B = 16, 128, 64
    table = jax.random.normal(k_t1, (grid_size ** 2, embed_dim), jnp.float32)
    x = jax.random.uniform(k_x1, (B, 2), jnp.float32)
    out = grid_embedding_forward(table, x, grid_size, block_b=32)
    out = jax.block_until_ready(out)
    ref = grid_embedding_reference(table, x, grid_size)
    np.testing.assert_allclose(np.asarray(out), np.asarray(ref), rtol=1e-6, atol=1e-6)
    assert out.shape == (B, embed_dim)

    # Case 2: ragged batch (B not a multiple of the tile) and non-128 embed dim
    # (exercises the V/E padding + output slicing path).
    grid_size2, embed_dim2, B2 = 5, 40, 13
    table2 = jax.random.normal(k_t2, (grid_size2 ** 2, embed_dim2), jnp.float32)
    x2 = jax.random.uniform(k_x2, (B2, 2), jnp.float32)
    out2 = grid_embedding_forward(table2, x2, grid_size2, block_b=8)
    out2 = jax.block_until_ready(out2)
    ref2 = grid_embedding_reference(table2, x2, grid_size2)
    np.testing.assert_allclose(np.asarray(out2), np.asarray(ref2), rtol=1e-6, atol=1e-6)
    assert out2.shape == (B2, embed_dim2)

    print("KERNEL_OK")
</pallas_src>

<mosaic_0001>
module attributes {stable_mosaic.version = 11 : i64} {
  func.func @_grid_embedding_kernel(%arg0: i32, %arg1: memref<32x1xi32, #tpu.memory_space<vmem>>, %arg2: memref<256x128xf32, #tpu.memory_space<vmem>>, %arg3: memref<32x128xf32, #tpu.memory_space<vmem>>) attributes {dimension_semantics = [#tpu.dimension_semantics<parallel>], iteration_bounds = array<i64: 2>, scalar_prefetch = 0 : i64, scratch_operands = 0 : i64, tpu.core_type = #tpu.core_type<tc>, window_params = [{transform_indices = @transform_0, window_bounds = array<i64: 32, 1>}, {pipeline_mode = #tpu.pipeline_mode<synchronous>, transform_indices = @transform_1, window_bounds = array<i64: 256, 128>}, {transform_indices = @transform_2, window_bounds = array<i64: 32, 128>}]} {
    %c0 = arith.constant 0 : index
    %c0_0 = arith.constant 0 : index
    %0 = vector.load %arg1[%c0, %c0_0] : memref<32x1xi32, #tpu.memory_space<vmem>>, vector<32x1xi32>
    %1 = tpu.iota {dimensions = array<i32: 1>} : vector<32x256xi32>
    %2 = vector.broadcast %0 : vector<32x1xi32> to vector<32x256xi32>
    %3 = arith.cmpi eq, %2, %1 : vector<32x256xi32>
    %4 = arith.extui %3 : vector<32x256xi1> to vector<32x256xi32>
    %5 = arith.sitofp %4 : vector<32x256xi32> to vector<32x256xf32>
    %c0_1 = arith.constant 0 : index
    %c0_2 = arith.constant 0 : index
    %6 = vector.load %arg2[%c0_1, %c0_2] : memref<256x128xf32, #tpu.memory_space<vmem>>, vector<256x128xf32>
    %cst = arith.constant dense<0.000000e+00> : vector<32x128xf32>
    %7 = tpu.matmul %5, %6, %cst {dimension_numbers = #tpu.dot_dimension_numbers<[1], [0], [0], [1], [0, 0, 1, 1], [], []>, precision = #tpu.contract_precision<fp32>} : vector<32x256xf32>, vector<256x128xf32>, vector<32x128xf32> -> vector<32x128xf32>
    %c0_3 = arith.constant 0 : index
    %c0_4 = arith.constant 0 : index
    %8 = vector.load %arg3[%c0_3, %c0_4] : memref<32x128xf32, #tpu.memory_space<vmem>>, vector<32x128xf32>
    tpu.vector_store %arg3[%c0_3, %c0_4], %7 {strides = array<i32>} : memref<32x128xf32, #tpu.memory_space<vmem>>, vector<32x128xf32>,
    return
  }
  func.func @transform_0(%arg0: i32) -> (i32, i32) {
    %c0_i32 = arith.constant 0 : i32
    %c0_i32_0 = arith.constant 0 : i32
    return %arg0, %c0_i32 : i32, i32
  }
  func.func @transform_1(%arg0: i32) -> (i32, i32) {
    %c0_i32 = arith.constant 0 : i32
    %c0_i32_0 = arith.constant 0 : i32
    %c0_i32_1 = arith.constant 0 : i32
    return %c0_i32, %c0_i32_0 : i32, i32
  }
  func.func @transform_2(%arg0: i32) -> (i32, i32) {
    %c0_i32 = arith.constant 0 : i32
    %c0_i32_0 = arith.constant 0 : i32
    return %arg0, %c0_i32 : i32, i32
  }
}

</mosaic_0001>

<bundles_post_ra>
// kernel: tpu_custom_call.1
= control target key start
LH: loop header
LB: loop body
LE: loop exit
PB: predicated region body
PF: predicated region fallthrough
CT: control target
= control target key end

     0   :  { %7 = vsyncpa [#allocation3], 0  ;;  %s3018_s0 = inlined_call_operand.vmem [shape: s32[64,1], index: 0, kind: input, shape index: {}]   ;;  %s3019_s1 = inlined_call_operand.hbm [shape: f32[256,128], index: 1, kind: input, shape index: {}]   ;;  %s3020_s2 = inlined_call_operand.hbm [shape: f32[64,128], index: 2, kind: output, shape index: {}]  }
   0x1   :  { %8 = vsyncpa [#allocation4], 0 }
   0x2   :  { %10 = vsyncpa [#allocation4 + $0x1], 0  ;;  %s2039_s9 = smov 0   ;;  %s2041_s10 = smov 0  }
   0x3   :  { %s2043_s11 = smov 0   ;;  %s2045_s12 = smov 0  }
   0x4 LB: > { %s2060_s13 = sadd.s32 4294967295, %s2013_s12   ;;  %s1357_s14 = sadd.s32 4294967294, %s2013_s12   ;;  %s2013_s12 = sphi %s2045_s12, %s3205_s12   ;;  %s2009_s11 = sphi %s2043_s11, %s3204_s11   ;;  %s2005_s10 = sphi %s2041_s10, %s3203_s10   ;;  %s2001_s9 = sphi %s2039_s9, %s3202_s9  }
   0x5   : > { %s2064_s15 = sadd.s32 1, %s2013_s12   ;;  %s70_s16 = sadd.s32 1, %s2009_s11 }
   0x6   : > { %s67_s17 = ssub.s32 %s2013_s12, %s2064_s15  ;;  %p80_p0 = scmp.ne.s32.totalorder %s2009_s11, %s2005_s10 }
   0x7   : > { %p68_p1 = scmp.eq.s32.totalorder %s67_s17, 0  ;;  %p81_p2 = scmp.eq.s32.totalorder %s2060_s13, 1 }
   0x8   : > { %p86_p3 = scmp.ne.s32.totalorder %s2005_s10, %s2001_s9  ;;  %p87_p4 = scmp.eq.s32.totalorder %s1357_s14, 1 }
   0x9   : > { %s2075_s18 = scalar_select %p68_p1, %s2009_s11, %s70_s16  }
   0xa   : > { %p2077_p5 = por %p81_p2, %p80_p0  ;;  %p2081_p6 = por %p87_p4, %p86_p3 }
   0xb   : > { %p1358_p7 = scmp.ge.s32.totalorder %s2013_s12, 1  ;;  %p94_p8 = scmp.lt.s32.totalorder %s2013_s12, 3 }
   0xc   : > { %s3081_s19 = scalar_select %p2077_p5, 1, 0 }
   0xd   : > { %s3082_s20 = scalar_select %p2081_p6, 1, 0 }
   0xe   : > { %p3021_p9 = scmp.eq.s32.totalorder %s2060_s13, 0  ;;  %p2088_p10 = pnand %p1358_p7, %p94_p8 }
   0xf   : > { %s2015_s22 = smov [#allocation2]   ;;  %s1919_s27 = scalar_lea.hbm %s3019_s1, 4096 }
  0x10   : > { %s3083_s21 = scalar_select %p2088_p10, 1, 0 }
  0x11   : > { %s106_s23 = sshll.u32 %s2015_s22, 4  ;;  %p1866_p11 = pneg %p2088_p10  ;;  %s107_s23 = int_to_ptr.vmem [resolvable:$true] %s106_s23 }
  0x12   : > { %p1920_p13 = scmp.ne.s32.totalorder %s3019_s1, %s1919_s27  ;;  %p1926_p3 = scmp.lt.u32.totalorder %s1919_s27, %s3019_s1 }
  0x13   : > { %p2096_p12 = pnand %p3021_p9, %p1866_p11 }
  0x15   : > { %p1921_p0 = pneg %p2096_p12 }
  0x17   : > { %p1922_p1 = pnand %p1921_p0, %p1920_p13 }
  0x19   : > { %p1923_p2 = pneg %p1922_p1 }
  0x1b   : > { %p1928_p4 = pnand %p1926_p3, %p1923_p2 }
  0x1d   : > { %1931 = shalt.err (!%p1928_p4)
}
  0x1e   : > { %s1932_s4 = scalar_lea.vmem %s107_s23, 4096  ;;  %p1940_p9 = scmp.lt.s32.totalorder %s107_s23, %s107_s23 }
  0x1f   : > { %p1933_p7 = scmp.ne.s32.totalorder %s107_s23, %s1932_s4  ;;  %p1941_p6 = scmp.lt.s32.totalorder %s1932_s4, %s1932_s4 }
  0x21   : > { %p1935_p8 = pnand %p1933_p7, %p1921_p0  ;;  %p1942_p5 = por %p1941_p6, %p1940_p9 }
  0x23   : > { %p1936_p11 = pneg %p1935_p8 }
  0x25   : > { %p1943_p10 = pnand %p1942_p5, %p1936_p11 }
  0x27   : > { %1946 = shalt.err (!%p1943_p10)
}
  0x28   : > { %s2016_s5 = smov 128   ;;  %s2017_s6 = smov 8  }
  0x29   : > { %1869 = dma.hbm_to_vmem [thread:$0]  (!%p2096_p12), %s3019_s1, 4096, %s107_s23, [#allocation3], %s2016_s5, %s2016_s5, %s2017_s6  }
  0x2a   : > { %p3085_p13 = scmp.ne.s32.totalorder %s3083_s21, 0 }
  0x2c   : > { %131 = sbr.rel (%p3085_p13) target bundleno = 512 (0x200), region = 28 }
  0x33   : > { %p3086_p1 = scmp.eq.s32.totalorder %s2060_s13, 0 }
  0x35   : > { %1992 = dma.done.wait (%p3086_p1), [#allocation3], 4096   ;;  %p3087_p0 = pmov %p3086_p1 }
  0x36   : > { %s1364_s14 = sshll.u32 %s2060_s13, 2  ;;  %v2018_v0 = vmov 0   ;;  %v219_v5 = vld [vmem:[#allocation2 + $0x80] sm:$0xff]  ;;  %v220_v6 = vld [vmem:[#allocation2 + $0x88] sm:$0xff]  ;;  %v2130_v11 = vld [vmem:[#allocation2 + $0x90] sm:$0xff]  ;;  %s150_s21 = sand.u32 1, %s2005_s10  }
  0x37   : > { %1994 = vsyncadd (%p3087_p0), [#allocation3], 4294963200  ;;  %1917 = vset.pattern.permute.xlu0 %v2018_v0  ;;  %p154_p5 = scmp.lt.s32.totalorder %s1364_s14, 7  ;;  %1918 = vset.pattern.permute.xlu1 %v2018_v0  ;;  %v284_v7 = vand.u32 4294901760, %v219_v5  ;;  %v287_v8 = vand.u32 4294901760, %v220_v6  ;;  %v2126_v9 = vld [vmem:[#allocation2] sm:$0xff] }
  0x38   : > { %v2128_v10 = vld [vmem:[#allocation2 + $0x8] sm:$0xff]  ;;  %v236_v12 = vand.u32 4294901760, %v2126_v9  ;;  %v2134_v14 = vld [vmem:[#allocation2 + $0x98] sm:$0xff]  ;;  %v290_v15 = vand.u32 4294901760, %v2130_v11  ;;  %v2137_v16 = vld [vmem:[#allocation2 + $0x10] sm:$0xff]  ;;  %s1363_s24 = sshll.u32 %s150_s21, 5 }
  0x39   : > { %s3207_s14 = smov (!%p154_p5, %s1364_s14), 7  ;;  %v239_v13 = vand.u32 4294901760, %v2128_v10  ;;  %v2139_v17 = vld [vmem:[#allocation2 + $0x18] sm:$0xff]  ;;  %v2141_v18 = vsub.f32 %v219_v5, %v284_v7  ;;  %v2143_v19 = vsub.f32 %v220_v6, %v287_v8  ;;  %v293_v20 = vand.u32 4294901760, %v2134_v14  ;;  %v2201_v42 = vld [vmem:[#allocation2 + $0xa0] sm:$0xff]  ;;  %v2209_v47 = vld [vmem:[#allocation2 + $0xa8] sm:$0xff] }
  0x3a   : > { %s1365_s16 = sshll.u32 %s3207_s14, 3  ;;  %v242_v21 = vand.u32 4294901760, %v2137_v16  ;;  %v2150_v22 = vsub.f32 %v2126_v9, %v236_v12  ;;  %v2160_v24 = vsub.f32 %v2130_v11, %v290_v15  ;;  %v245_v25 = vand.u32 4294901760, %v2139_v17  ;;  %v2214_v52 = vld [vmem:[#allocation2 + $0x20] sm:$0xff]  ;;  %v2216_v53 = vld [vmem:[#allocation2 + $0x28] sm:$0xff]  ;;  %v2219_v58 = vld [vmem:[#allocation2 + $0xb0] sm:$0xff] }
  0x3b   : > { %s157_s23 = scalar_lea.vmem %s3018_s0, %s1365_s16  ;;  %v2155_v23 = vsub.f32 %v2128_v10, %v239_v13  ;;  %v3044_v26 = vand.u32 4294901760, %v2141_v18  ;;  %v3042_v27 = vand.u32 4294901760, %v2143_v19  ;;  %v2168_v28 = vsub.f32 %v2134_v14, %v293_v20  ;;  %v2224_v63 = vld [vmem:[#allocation2 + $0xb8] sm:$0xff]  ;;  %s152_s25 = scalar_lea.vmem [#allocation5], %s1363_s24 }
  0x3c   : > { %v160_v1 = vld [vmem:[%s157_s23] sm:$0xff]  ;;  %v161_v2 = vld [vmem:[%s157_s23 + $0x8] sm:$0xff]  ;;  %v162_v3 = vld [vmem:[%s157_s23 + $0x10] sm:$0xff]  ;;  %v2173_v29 = vsub.f32 %v2137_v16, %v242_v21  ;;  %v3040_v30 = vand.u32 4294901760, %v2150_v22  ;;  %v3037_v32 = vand.u32 4294901760, %v2160_v24  ;;  %v2181_v33 = vsub.f32 %v2139_v17, %v245_v25  ;;  %s1283_s26 = sshll.u32 %s152_s25, 4  ;;  %s2968_s26 = int_to_ptr.vmem [resolvable:$true] %s1283_s26 }
  0x3d   : > { %168 = vperm.xlu0 %1917, %v160_v1   ;;  %174 = vperm.xlu1 %1918, %v162_v3   ;;  %v163_v4 = vld [vmem:[%s157_s23 + $0x18] sm:$0xff]  ;;  %v3038_v31 = vand.u32 4294901760, %v2155_v23  ;;  %v508_v34 = vsub.f32 %v2141_v18, %v3044_v26  ;;  %v515_v35 = vsub.f32 %v2143_v19, %v3042_v27  ;;  %v3036_v36 = vand.u32 4294901760, %v2168_v28  ;;  %v2449_v26 = vld [vmem:[#allocation2 + $0x60] sm:$0xff]  ;;  %s1403_s27 = sshll.u32 %s2060_s13, 9  ;;  %s2977_s3 = scalar_lea.sflag [#allocation4], %s150_s21 }
  0x3e   : > { %v3033_v37 = vand.u32 4294901760, %v2173_v29  ;;  %v396_v38 = vsub.f32 %v2150_v22, %v3040_v30  ;;  %v522_v40 = vsub.f32 %v2160_v24, %v3037_v32  ;;  %v3029_v41 = vand.u32 4294901760, %v2181_v33  ;;  %v2260_v10 = vld [vmem:[#allocation2 + $0x38] sm:$0xff]  ;;  %v2423_v32 = vld [vmem:[#allocation2 + $0xe0] sm:$0xff]  ;;  %s2973_s30 = scalar_lea.hbm %s3020_s2, %s1403_s27  ;;  %s1947_s4 = scalar_lea.vmem %s2968_s26, 512 }
  0x3f   : > { %v403_v39 = vsub.f32 %v2155_v23, %v3038_v31  ;;  %v509_v43 = vand.u32 4294901760, %v508_v34  ;;  %v516_v44 = vand.u32 4294901760, %v515_v35  ;;  %v529_v45 = vsub.f32 %v2168_v28, %v3036_v36  ;;  %p1948_p6 = scmp.ne.s32.totalorder %s2968_s26, %s1947_s4  ;;  %p3200_p9 = scmp.ne.s32.totalorder %s3081_s19, 0 }
  0x40   : > { %v410_v46 = vsub.f32 %v2173_v29, %v3033_v37  ;;  %v397_v48 = vand.u32 4294901760, %v396_v38  ;;  %v523_v50 = vand.u32 4294901760, %v522_v40  ;;  %v417_v51 = vsub.f32 %v2181_v33, %v3029_v41  ;;  %s2021_s13 = smov [#allocation5]  }
  0x41   : > { %171 = vperm.xlu0 %1917, %v161_v2   ;;  %177 = vperm.xlu1 %1918, %v163_v4   ;;  %v404_v49 = vand.u32 4294901760, %v403_v39  ;;  %v1700_v54 = vpack.c.bf16 %v516_v44, %v509_v43  ;;  %v530_v55 = vand.u32 4294901760, %v529_v45  ;;  %v296_v57 = vand.u32 4294901760, %v2201_v42  ;;  %v2233_v4 = vld [vmem:[#allocation2 + $0x30] sm:$0xff]  ;;  %p1949_p10 = pnand %p1948_p6, %p3200_p9  ;;  %s1951_s5 = sshll.u32 %s2021_s13, 4  ;;  %s1952_s5 = int_to_ptr.vmem [resolvable:$false] %s1951_s5 }
  0x42   : > { %v411_v56 = vand.u32 4294901760, %v410_v46  ;;  %v418_v60 = vand.u32 4294901760, %v417_v51  ;;  %v299_v61 = vand.u32 4294901760, %v2209_v47  ;;  %v2222_v62 = vpack.c.bf16 %v287_v8, %v284_v7  ;;  %s1953_s6 = scalar_lea.vmem %s1952_s5, 1024  ;;  %p1954_p2 = scmp.lt.s32.totalorder %s2968_s26, %s1952_s5 }
  0x43   : > { %v1702_v59 = vpack.c.bf16 %v404_v49, %v397_v48  ;;  %1701 = vmatprep.subr.bf16.mxu1 %v1700_v54  ;;  %v1704_v0 = vpack.c.bf16 %v530_v55, %v523_v50  ;;  %v2229_v1 = vsub.f32 %v2201_v42, %v296_v57  ;;  %v248_v2 = vand.u32 4294901760, %v2214_v52  ;;  %p1950_p12 = pneg %p1949_p10  ;;  %p1955_p3 = scmp.lt.s32.totalorder %s1953_s6, %s1947_s4 }
  0x44   : > { %v251_v3 = vand.u32 4294901760, %v2216_v53  ;;  %v1706_v5 = vpack.c.bf16 %v418_v60, %v411_v56  ;;  %v2238_v6 = vsub.f32 %v2209_v47, %v299_v61  ;;  %1669 = vmatprep.subr.bf16.mxu0 %v2222_v62  ;;  %v2245_v7 = vpack.c.bf16 %v239_v13, %v236_v12  ;;  %v2313_v60 = vld [vmem:[#allocation2 + $0xc0] sm:$0xff] }
  0x45   : > { %1703 = vmatpush3.bf16.msra.mxu1 %v1702_v59  ;;  %v302_v8 = vand.u32 4294901760, %v2219_v58  ;;  %v3028_v34 = vand.u32 4294901760, %v2229_v1  ;;  %v2252_v35 = vsub.f32 %v2214_v52, %v248_v2  ;;  %v305_v9 = vand.u32 4294901760, %v2224_v63  ;;  %v2385_v52 = vld [vmem:[#allocation2 + $0x58] sm:$0xff]  ;;  %p1956_p4 = por %p1955_p3, %p1954_p2 }
  0x46   : > { %1705 = vmatprep.subr.bf16.mxu1 %v1704_v0  ;;  %v2257_v38 = vsub.f32 %v2216_v53, %v251_v3  ;;  %v3027_v12 = vand.u32 4294901760, %v2238_v6  ;;  %1671 = vmatpush3.bf16.msra.mxu0 %v2245_v7  ;;  %v2273_v39 = vpack.c.bf16 %v293_v20, %v290_v15  ;;  %v254_v40 = vand.u32 4294901760, %v2233_v4  ;;  %v2315_v0 = vld [vmem:[#allocation2 + $0xc8] sm:$0xff] }
  0x47   : > { %v2267_v13 = vsub.f32 %v2219_v58, %v302_v8  ;;  %v536_v43 = vsub.f32 %v2229_v1, %v3028_v34  ;;  %v3026_v44 = vand.u32 4294901760, %v2252_v35  ;;  %v2284_v46 = vsub.f32 %v2224_v63, %v305_v9  ;;  %p1957_p7 = pnand %p1956_p4, %p1950_p12 }
  0x48   : > { %v3025_v45 = vand.u32 4294901760, %v2257_v38  ;;  %v543_v11 = vsub.f32 %v2238_v6, %v3027_v12  ;;  %1673 = vmatprep.subr.bf16.mxu0 %v2273_v39  ;;  %v257_v15 = vand.u32 4294901760, %v2260_v10  ;;  %v2295_v20 = vsub.f32 %v2233_v4, %v254_v40 }
  0x49   : > { %1707 = vmatpush3.bf16.msra.mxu1 %v1706_v5  ;;  %v3024_v14 = vand.u32 4294901760, %v2267_v13  ;;  %v537_v48 = vand.u32 4294901760, %v536_v43  ;;  %v424_v49 = vsub.f32 %v2252_v35, %v3026_v44  ;;  %v3030_v51 = vand.u32 4294901760, %v2284_v46 }
  0x4a   : > { %v431_v50 = vsub.f32 %v2257_v38, %v3025_v45  ;;  %v544_v54 = vand.u32 4294901760, %v543_v11  ;;  %v3032_v56 = vand.u32 4294901760, %v2295_v20  ;;  %v2311_v59 = vsub.f32 %v2260_v10, %v257_v15  ;;  %v2326_v45 = vld [vmem:[#allocation2 + $0x40] sm:$0xff] }
  0x4b   : > { %v550_v55 = vsub.f32 %v2267_v13, %v3024_v14  ;;  %v425_v5 = vand.u32 4294901760, %v424_v49  ;;  %v557_v11 = vsub.f32 %v2284_v46, %v3030_v51  ;;  %v2324_v14 = vpack.c.bf16 %v245_v25, %v242_v21  ;;  %v2337_v21 = vld [vmem:[#allocation2 + $0xd0] sm:$0xff] }
  0x4c   : > { %v432_v43 = vand.u32 4294901760, %v431_v50  ;;  %v1708_v44 = vpack.c.bf16 %v544_v54, %v537_v48  ;;  %v438_v34 = vsub.f32 %v2295_v20, %v3032_v56  ;;  %v3031_v49 = vand.u32 4294901760, %v2311_v59  ;;  %v2332_v50 = vld [vmem:[#allocation2 + $0x48] sm:$0xff] }
  0x4d   : > { %v551_v12 = vand.u32 4294901760, %v550_v55  ;;  %v558_v51 = vand.u32 4294901760, %v557_v11  ;;  %1675 = vmatpush3.bf16.msra.mxu0 %v2324_v14  ;;  %v308_v16 = vand.u32 4294901760, %v2313_v60  ;;  %v311_v17 = vand.u32 4294901760, %v2315_v0 }
  0x4e   : > { %v1710_v41 = vpack.c.bf16 %v432_v43, %v425_v5  ;;  %1709 = vmatprep.subr.bf16.mxu1 %v1708_v44  ;;  %v439_v25 = vand.u32 4294901760, %v438_v34  ;;  %v445_v48 = vsub.f32 %v2311_v59, %v3031_v49  ;;  %v2346_v54 = vpack.c.bf16 %v299_v61, %v296_v57  ;;  %v2349_v5 = vld [vmem:[#allocation2 + $0xd8] sm:$0xff]  ;;  %v2383_v49 = vld [vmem:[#allocation2 + $0x50] sm:$0xff] }
  0x4f   : > { %v260_v55 = vand.u32 4294901760, %v2326_v45  ;;  %v1712_v43 = vpack.c.bf16 %v558_v51, %v551_v12  ;;  %v2354_v34 = vsub.f32 %v2313_v60, %v308_v16  ;;  %v2359_v44 = vsub.f32 %v2315_v0, %v311_v17 }
  0x50   : > { %3088 = vst [vmem:[#allocation8_spill] sm:$0xff] %v2346_v54  ;;  %1711 = vmatpush3.bf16.msra.mxu1 %v1710_v41  ;;  %v263_v42 = vand.u32 4294901760, %v2332_v50  ;;  %v446_v47 = vand.u32 4294901760, %v445_v48  ;;  %1677 = vmatprep.subr.bf16.mxu0 %v2346_v54  ;;  %v2372_v57 = vpack.c.bf16 %v251_v3, %v248_v2  ;;  %v3048_v61 = vand.u32 4294901760, %v2337_v21 }
  0x51   : > { %v2366_v41 = vsub.f32 %v2326_v45, %v260_v55  ;;  %1713 = vmatprep.subr.bf16.mxu1 %v1712_v43  ;;  %v3035_v12 = vand.u32 4294901760, %v2354_v34  ;;  %v3034_v51 = vand.u32 4294901760, %v2359_v44  ;;  %v3047_v48 = vand.u32 4294901760, %v2349_v5 }
  0x52   : > { %v2380_v11 = vsub.f32 %v2332_v50, %v263_v42  ;;  %v1714_v53 = vpack.c.bf16 %v446_v47, %v439_v25  ;;  %1679 = vmatpush3.bf16.msra.mxu0 %v2372_v57  ;;  %v2392_v3 = vsub.f32 %v2337_v21, %v3048_v61  ;;  %v2398_v43 = vpack.c.bf16 %v305_v9, %v302_v8  ;;  %v218_v50 = vld [vmem:[#allocation2 + $0x78] sm:$0xff] }
  0x53   : > { %v3039_v2 = vand.u32 4294901760, %v2366_v41  ;;  %v564_v56 = vsub.f32 %v2354_v34, %v3035_v12  ;;  %v571_v25 = vsub.f32 %v2359_v44, %v3034_v51  ;;  %v2410_v37 = vsub.f32 %v2349_v5, %v3047_v48 }
  0x54   : > { %v3041_v47 = vand.u32 4294901760, %v2380_v11  ;;  %1715 = vmatpush3.bf16.msra.mxu1 %v1714_v53  ;;  %v3043_v63 = vand.u32 4294901760, %v2392_v3  ;;  %1681 = vmatprep.subr.bf16.mxu0 %v2398_v43  ;;  %v3045_v8 = vand.u32 4294901760, %v2383_v49  ;;  %v3046_v9 = vand.u32 4294901760, %v2385_v52 }
  0x55   : > { %v452_v58 = vsub.f32 %v2366_v41, %v3039_v2  ;;  %v565_v51 = vand.u32 4294901760, %v564_v56  ;;  %v572_v12 = vand.u32 4294901760, %v571_v25  ;;  %v3051_v53 = vand.u32 4294901760, %v2410_v37  ;;  %v2438_v25 = vld [vmem:[#allocation2 + $0xe8] sm:$0xff] }
  0x56   : > { %v459_v36 = vsub.f32 %v2380_v11, %v3041_v47  ;;  %v578_v2 = vsub.f32 %v2392_v3, %v3043_v63  ;;  %v2431_v30 = vsub.f32 %v2383_v49, %v3045_v8  ;;  %v2436_v56 = vsub.f32 %v2385_v52, %v3046_v9 }
  0x57   : > { %v453_v31 = vand.u32 4294901760, %v452_v58  ;;  %v1716_v47 = vpack.c.bf16 %v572_v12, %v565_v51  ;;  %v585_v58 = vsub.f32 %v2410_v37, %v3051_v53  ;;  %v2447_v63 = vpack.c.bf16 %v257_v15, %v254_v40 }
  0x58   : > { %v460_v27 = vand.u32 4294901760, %v459_v36  ;;  %v579_v8 = vand.u32 4294901760, %v578_v2  ;;  %v3050_v9 = vand.u32 4294901760, %v2431_v30  ;;  %v3049_v48 = vand.u32 4294901760, %v2436_v56  ;;  %v216_v36 = vld [vmem:[#allocation2 + $0x68] sm:$0xff]  ;;  %v233_v2 = vld [vmem:[#allocation2 + $0xf0] sm:$0xff] }
  0x59   : > { %3089 = vst [vmem:[#allocation9_spill] sm:$0xff] %v2447_v63  ;;  %v320_v12 = vand.u32 4294901760, %v2423_v32  ;;  %1717 = vmatprep.subr.bf16.mxu1 %v1716_v47  ;;  %v586_v61 = vand.u32 4294901760, %v585_v58  ;;  %1683 = vmatpush3.bf16.msra.mxu0 %v2447_v63  ;;  %v323_v4 = vand.u32 4294901760, %v2438_v25  ;;  %v2460_v10 = vpack.c.bf16 %v311_v17, %v308_v16  ;;  %v234_v47 = vld [vmem:[#allocation2 + $0xf8] sm:$0xff] }
  0x5a   : > { %v1718_v51 = vpack.c.bf16 %v460_v27, %v453_v31  ;;  %v466_v40 = vsub.f32 %v2431_v30, %v3050_v9  ;;  %v473_v15 = vsub.f32 %v2436_v56, %v3049_v48  ;;  %v272_v31 = vand.u32 4294901760, %v2449_v26 }
  0x5b   : > { %3090 = vst [vmem:[#allocation10_spill] sm:$0xff] %v2460_v10  ;;  %v2469_v27 = vsub.f32 %v2423_v32, %v320_v12  ;;  %v1720_v60 = vpack.c.bf16 %v586_v61, %v579_v8  ;;  %v2473_v0 = vsub.f32 %v2438_v25, %v323_v4  ;;  %1685 = vmatprep.subr.bf16.mxu0 %v2460_v10  ;;  %v275_v16 = vand.u32 4294901760, %v216_v36 }
  0x5c   : > { %1719 = vmatpush3.bf16.msra.mxu1 %v1718_v51  ;;  %v2480_v17 = vpack.c.bf16 %v263_v42, %v260_v55  ;;  %v467_v32 = vand.u32 4294901760, %v466_v40  ;;  %v474_v58 = vand.u32 4294901760, %v473_v15  ;;  %v2484_v9 = vsub.f32 %v2449_v26, %v272_v31  ;;  %v217_v51 = vld [vmem:[#allocation2 + $0x70] sm:$0xff] }
  0x5d   : > { %v3055_v48 = vand.u32 4294901760, %v2469_v27  ;;  %1721 = vmatprep.subr.bf16.mxu1 %v1720_v60  ;;  %v3054_v61 = vand.u32 4294901760, %v2473_v0  ;;  %v2487_v8 = vsub.f32 %v216_v36, %v275_v16  ;;  %v326_v25 = vand.u32 4294901760, %v233_v2 }
  0x5e   : > { %3091 = vst [vmem:[#allocation11_spill] sm:$0xff] %v2480_v17  ;;  %1687 = vmatpush3.bf16.msra.mxu0 %v2480_v17  ;;  %v329_v45 = vand.u32 4294901760, %v234_v47  ;;  %v1722_v55 = vpack.c.bf16 %v474_v58, %v467_v32  ;;  %v3056_v40 = vand.u32 4294901760, %v2484_v9  ;;  %v3092_v26 = vand.u32 4294901760, %v2337_v21 }
  0x5f   : > { %v592_v42 = vsub.f32 %v2469_v27, %v3055_v48  ;;  %v3093_v15 = vand.u32 4294901760, %v2349_v5  ;;  %v599_v36 = vsub.f32 %v2473_v0, %v3054_v61  ;;  %v3063_v53 = vand.u32 4294901760, %v2487_v8 }
  0x60   : > { %v2504_v17 = vsub.f32 %v233_v2, %v326_v25  ;;  %v2506_v32 = vsub.f32 %v234_v47, %v329_v45  ;;  %1723 = vmatpush3.bf16.msra.mxu1 %v1722_v55  ;;  %v480_v21 = vsub.f32 %v2484_v9, %v3056_v40  ;;  %v278_v5 = vand.u32 4294901760, %v217_v51 }
  0x61   : > { %v2498_v60 = vpack.c.bf16 %v3093_v15, %v3092_v26  ;;  %v593_v58 = vand.u32 4294901760, %v592_v42  ;;  %v281_v26 = vand.u32 4294901760, %v218_v50  ;;  %v600_v15 = vand.u32 4294901760, %v599_v36 }
  0x62   : > { %v487_v61 = vsub.f32 %v2487_v8, %v3063_v53  ;;  %v3065_v2 = vand.u32 4294901760, %v2504_v17  ;;  %v3064_v47 = vand.u32 4294901760, %v2506_v32  ;;  %v481_v48 = vand.u32 4294901760, %v480_v21 }
  0x63   : > { %3094 = vst [vmem:[#allocation12_spill] sm:$0xff] %v2498_v60  ;;  %1689 = vmatprep.subr.bf16.mxu0 %v2498_v60  ;;  %v2517_v55 = vsub.f32 %v217_v51, %v278_v5  ;;  %v2519_v42 = vsub.f32 %v218_v50, %v281_v26  ;;  %v3097_v40 = vand.u32 4294901760, %v2383_v49  ;;  %v3098_v60 = vand.u32 4294901760, %v2385_v52 }
  0x64   : > { %v1724_v36 = vpack.c.bf16 %v600_v15, %v593_v58  ;;  %v488_v63 = vand.u32 4294901760, %v487_v61  ;;  %v606_v53 = vsub.f32 %v2504_v17, %v3065_v2  ;;  %v613_v21 = vsub.f32 %v2506_v32, %v3064_v47 }
  0x65   : > { %3095 = vst [vmem:[#allocation13_spill] sm:$0xff] %v2517_v55  ;;  %3096 = vst [vmem:[#allocation14_spill] sm:$0xff] %v2519_v42  ;;  %v2525_v10 = vpack.c.bf16 %v3098_v60, %v3097_v40  ;;  %v493_v51 = vand.u32 4294901760, %v2517_v55  ;;  %v500_v50 = vand.u32 4294901760, %v2519_v42  ;;  %v2536_v49 = vpack.c.bf16 %v323_v4, %v320_v12 }
  0x66   : > { %v2538_v52 = vpack.c.bf16 %v275_v16, %v272_v31  ;;  %1725 = vmatprep.subr.bf16.mxu1 %v1724_v36  ;;  %v1726_v61 = vpack.c.bf16 %v488_v63, %v481_v48  ;;  %v607_v40 = vand.u32 4294901760, %v606_v53  ;;  %v614_v60 = vand.u32 4294901760, %v613_v21 }
  0x67   : > { %1691 = vmatpush3.bf16.msra.mxu0 %v2525_v10  ;;  %v2540_v58 = vpack.c.bf16 %v329_v45, %v326_v25  ;;  %v494_v15 = vsub.f32 %v2517_v55, %v493_v51  ;;  %v501_v47 = vsub.f32 %v2519_v42, %v500_v50  ;;  %v2545_v2 = vpack.c.bf16 %v281_v26, %v278_v5 }
  0x68   : > { %1693 = vmatprep.subr.bf16.mxu0 %v2536_v49  ;;  %v1732_v12 = vpack.c.bf16 %v2143_v19, %v2141_v18  ;;  %1727 = vmatpush3.bf16.msra.mxu1 %v1726_v61  ;;  %v1728_v4 = vpack.c.bf16 %v614_v60, %v607_v40  ;;  %v3100_v61 = vand.u32 4294901760, %v2143_v19  ;;  %v3102_v60 = vand.u32 4294901760, %v2150_v22 }
  0x69   : > { %v495_v31 = vand.u32 4294901760, %v494_v15  ;;  %v502_v16 = vand.u32 4294901760, %v501_v47  ;;  %v3103_v21 = vand.u32 4294901760, %v2155_v23  ;;  %v3106_v47 = vand.u32 4294901760, %v2168_v28 }
  0x6a   : > { %1729 = vmatprep.subr.bf16.mxu1 %v1728_v4  ;;  %v3105_v4 = vand.u32 4294901760, %v2160_v24  ;;  %v3109_v19 = vand.u32 4294901760, %v2181_v33  ;;  %v3118_v26 = vand.u32 4294901760, %v2284_v46 }
  0x6b   : > { %1695 = vmatpush3.bf16.msra.mxu0 %v2538_v52  ;;  %v1730_v36 = vpack.c.bf16 %v502_v16, %v495_v31  ;;  %v3099_v16 = vand.u32 4294901760, %v2141_v18  ;;  %v2592_v15 = vpack.c.bf16 %v3103_v21, %v3102_v60  ;;  %v3108_v18 = vand.u32 4294901760, %v2173_v29 }
  0x6c   : > { %1697 = vmatprep.subr.bf16.mxu0 %v2540_v58  ;;  %v2598_v31 = vpack.c.bf16 %v3106_v47, %v3105_v4  ;;  %v3112_v21 = vand.u32 4294901760, %v2238_v6  ;;  %v3115_v47 = vand.u32 4294901760, %v2257_v38 }
  0x6d   : > { %1731 = vmatpush3.bf16.msra.mxu1 %v1730_v36  ;;  %v2586_v40 = vpack.c.bf16 %v3100_v61, %v3099_v16  ;;  %3104 = vst [vmem:[#allocation16_spill] sm:$0xff] %v2592_v15  ;;  %v2605_v36 = vpack.c.bf16 %v3109_v19, %v3108_v18  ;;  %v3111_v61 = vand.u32 4294901760, %v2229_v1  ;;  %v3114_v16 = vand.u32 4294901760, %v2252_v35 }
  0x6e   : > { %3107 = vst [vmem:[#allocation17_spill] sm:$0xff] %v2598_v31  ;;  %1765 = vmatprep.subr.bf16.mxu1 %v2222_v62  ;;  %v3120_v18 = vand.u32 4294901760, %v2295_v20  ;;  %v3121_v19 = vand.u32 4294901760, %v2311_v59 }
  0x6f   : > { %1699 = vmatpush3.bf16.msra.mxu0 %v2545_v2  ;;  %3101 = vst [vmem:[#allocation15_spill] sm:$0xff] %v2586_v40  ;;  %3110 = vst [vmem:[#allocation18_spill] sm:$0xff] %v2605_v36  ;;  %v2611_v60 = vpack.c.bf16 %v3112_v21, %v3111_v61  ;;  %v2617_v4 = vpack.c.bf16 %v3115_v47, %v3114_v16  ;;  %v3123_v61 = vand.u32 4294901760, %v2354_v34  ;;  %v3124_v21 = vand.u32 4294901760, %v2359_v44 }
  0x70   : > { %1733 = vmatprep.subr.bf16.mxu0 %v1732_v12  ;;  %v3117_v12 = vand.u32 4294901760, %v2267_v13  ;;  %v2629_v45 = vpack.c.bf16 %v3121_v19, %v3120_v18  ;;  %v3126_v16 = vand.u32 4294901760, %v2366_v41  ;;  %v3127_v47 = vand.u32 4294901760, %v2380_v11 }
  0x71   : > { %3113 = vst [vmem:[#allocation19_spill] sm:$0xff] %v2611_v60  ;;  %3116 = vst [vmem:[#allocation20_spill] sm:$0xff] %v2617_v4  ;;  %v2635_v25 = vpack.c.bf16 %v3124_v21, %v3123_v61  ;;  %v3132_v18 = vand.u32 4294901760, %v2431_v30  ;;  %v3133_v19 = vand.u32 4294901760, %v2436_v56  ;;  %v3135_v61 = vand.u32 4294901760, %v2469_v27 }
  0x72   : > { %v2623_v5 = vpack.c.bf16 %v3118_v26, %v3117_v12  ;;  %3122 = vst [vmem:[#allocation22_spill] sm:$0xff] %v2629_v45  ;;  %v2641_v53 = vpack.c.bf16 %v3127_v47, %v3126_v16  ;;  %v3129_v26 = vand.u32 4294901760, %v2392_v3  ;;  %v3130_v12 = vand.u32 4294901760, %v2410_v37 }
  0x73   : > { %3125 = vst [vmem:[#allocation23_spill] sm:$0xff] %v2635_v25  ;;  %v2653_v48 = vpack.c.bf16 %v3133_v19, %v3132_v18  ;;  %v3136_v21 = vand.u32 4294901760, %v2473_v0  ;;  %v3138_v16 = vand.u32 4294901760, %v2484_v9  ;;  %v3139_v47 = vand.u32 4294901760, %v2487_v8 }
  0x74   : > { %3119 = vst [vmem:[#allocation21_spill] sm:$0xff] %v2623_v5  ;;  %3128 = vst [vmem:[#allocation24_spill] sm:$0xff] %v2641_v53  ;;  %v2647_v63 = vpack.c.bf16 %v3130_v12, %v3129_v26  ;;  %v3141_v26 = vand.u32 4294901760, %v2504_v17  ;;  %v3142_v12 = vand.u32 4294901760, %v2506_v32  ;;  %v2673_v18 = vpack.c.bf16 %v500_v50, %v493_v51 }
  0x75   : > { %3134 = vst [vmem:[#allocation26_spill] sm:$0xff] %v2653_v48  ;;  %v2659_v25 = vpack.c.bf16 %v3136_v21, %v3135_v61  ;;  %v2665_v53 = vpack.c.bf16 %v3139_v47, %v3138_v16  ;;  %v164_v19 = vlaneseq  ;;  %v2019_v51 = vmov 0.0  }
  0x76   : > { %3131 = vst [vmem:[#allocation25_spill] sm:$0xff] %v2647_v63  ;;  %v2671_v63 = vpack.c.bf16 %v3142_v12, %v3141_v26  ;;  %3144 = vst [vmem:[#allocation30_spill] sm:$0xff] %v2673_v18  ;;  %v2020_v16 = vmov 1.0  }
  0x77   : > { %3137 = vst [vmem:[#allocation27_spill] sm:$0xff] %v2659_v25  ;;  %3140 = vst [vmem:[#allocation28_spill] sm:$0xff] %v2665_v53  ;;  %v2675_v48 = vand.u32 127, %v164_v19 }
  0x78   : > { %3143 = vst [vmem:[#allocation29_spill] sm:$0xff] %v2671_v63 }
  0x79   : > { %v2678_v61 = vadd.s32 128, %v2675_v48 }
  0x7b   : > { %3145 = vst [vmem:[#allocation31_spill] sm:$0xff] %v2678_v61 }
  0xbc   : > { %v2680_v21 = vpop.permute.xlu0 %168  ;;  %v2682_v25 = vpop.permute.xlu1 %174 }
  0xbd   : > { %3146 = vst [vmem:[#allocation32_spill] sm:$0xff] %v2680_v21  ;;  %3147 = vst [vmem:[#allocation33_spill] sm:$0xff] %v2682_v25  ;;  %vm179_vm0 = vcmp.eq.s32.totalorder %v2680_v21, %v2675_v48  ;;  %vm180_vm1 = vcmp.eq.s32.totalorder %v2680_v21, %v2678_v61  ;;  %vm183_vm2 = vcmp.eq.s32.totalorder %v2682_v25, %v2675_v48 }
  0xbe   : > { %vm184_vm3 = vcmp.eq.s32.totalorder %v2682_v25, %v2678_v61  ;;  %v1366_v50 = vsel %vm179_vm0, 1.0, %v2019_v51  ;;  %1374 = vmatprep.mubr.msk.f32.mxu1 %vm180_vm1, %v2020_v16  ;;  %v1370_v47 = vsel %vm183_vm2, 1.0, %v2019_v51  ;;  %v1367_v12 = vsel %vm180_vm1, 1.0, %v2019_v51 }
  0xbf   : > { %v1371_v26 = vsel %vm184_vm3, 1.0, %v2019_v51  ;;  %1375 = vmatmul.mubr.msk.f32.vlgmr.msra.gmra.mrb[0].mxu1 %vm179_vm0, %v2020_v16  ;;  %v2712_v19 = vsub.f32 %v1367_v12, %v1367_v12  ;;  %v2714_v18 = vsub.f32 %v1366_v50, %v1366_v50  ;;  %v2721_v45 = vsub.f32 %v1370_v47, %v1370_v47 }
  0xc0   : > { %1767 = vmatpush3.bf16.msra.mxu1 %v2245_v7  ;;  %v2717_v63 = vpop.permute.xlu0 %171  ;;  %v2719_v53 = vsub.f32 %v1371_v26, %v1371_v26  ;;  %v2723_v5 = vpop.permute.xlu1 %177 }
  0xc1   : > { %3148 = vst [vmem:[#allocation34_spill] sm:$0xff] %v2714_v18  ;;  %3149 = vst [vmem:[#allocation35_spill] sm:$0xff] %v2717_v63  ;;  %vm181_vm4 = vcmp.eq.s32.totalorder %v2717_v63, %v2675_v48  ;;  %vm182_vm5 = vcmp.eq.s32.totalorder %v2717_v63, %v2678_v61  ;;  %1769 = vmatprep.subr.bf16.mxu1 %v2273_v39  ;;  %v333_v50 = vand.u32 4294901760, %v2712_v19  ;;  %v3152_v25 = vand.u32 4294901760, %v2721_v45 }
  0xc2   : > { %vm185_vm6 = vcmp.eq.s32.totalorder %v2723_v5, %v2675_v48  ;;  %v1368_v47 = vsel %vm181_vm4, 1.0, %v2019_v51  ;;  %v1369_v26 = vsel %vm182_vm5, 1.0, %v2019_v51  ;;  %1376 = vmatprep.mubr.msk.f32.mxu1 %vm182_vm5, %v2020_v16  ;;  %vm186_vm7 = vcmp.eq.s32.totalorder %v2723_v5, %v2678_v61 }
  0xc3   : > { %v1372_v12 = vsel %vm185_vm6, 1.0, %v2019_v51  ;;  %v2748_v4 = vsub.f32 %v1369_v26, %v1369_v26  ;;  %v2750_v60 = vsub.f32 %v1368_v47, %v1368_v47  ;;  %1377 = vmatmul.mubr.msk.f32.gmra.mrb[2].mxu1 %vm181_vm4, %v2020_v16  ;;  %v334_v36 = vsub.f32 %v2712_v19, %v333_v50 }
  0xc4   : > { %v1373_v21 = vsel %vm186_vm7, 1.0, %v2019_v51  ;;  %1771 = vmatpush3.bf16.msra.mxu1 %v2324_v14  ;;  %1378 = vmatprep.mubr.msk.f32.mxu1 %vm184_vm3, %v2020_v16  ;;  %v339_v26 = vand.u32 4294901760, %v2714_v18  ;;  %v3077_v63 = vand.u32 4294901760, %v2719_v53  ;;  %v2772_v40 = vsub.f32 %v1372_v12, %v1372_v12 }
  0xc5   : > { %3150 = vst [vmem:[#allocation36_spill] sm:$0xff] %v2748_v4  ;;  %3151 = vst [vmem:[#allocation37_spill] sm:$0xff] %v2750_v60  ;;  %v2765_v47 = vsub.f32 %v1373_v21, %v1373_v21  ;;  %1773 = vmatprep.subr.bf16.mxu1 %v2346_v54  ;;  %v335_v31 = vand.u32 4294901760, %v334_v36  ;;  %v348_v15 = vand.u32 4294901760, %v2748_v4  ;;  %v354_v51 = vand.u32 4294901760, %v2750_v60 }
  0xc6   : > { %v340_v55 = vsub.f32 %v2714_v18, %v339_v26  ;;  %v364_v54 = vsub.f32 %v2719_v53, %v3077_v63  ;;  %v384_v63 = vand.u32 4294901760, %v2772_v40 }
  0xc7   : > { %336 = vmatprep.mubr.f32.mxu0 %v335_v31  ;;  %1379 = vmatmul.mubr.msk.f32.gmra.mrb[4].mxu1 %vm183_vm2, %v2020_v16  ;;  %v349_v21 = vsub.f32 %v2748_v4, %v348_v15  ;;  %v355_v36 = vsub.f32 %v2750_v60, %v354_v51  ;;  %v378_v12 = vand.u32 4294901760, %v2765_v47  ;;  %v370_v60 = vsub.f32 %v2721_v45, %v3152_v25  ;;  %v3155_v25 = vld [vmem:[#allocation9_spill] sm:$0xff] }
  0xc8   : > { %1775 = vmatpush3.bf16.msra.mxu1 %v2372_v57  ;;  %v341_v18 = vand.u32 4294901760, %v340_v55  ;;  %1380 = vmatprep.mubr.msk.f32.mxu1 %vm186_vm7, %v2020_v16  ;;  %v3153_v4 = vpack.c.bf16 %v2155_v23, %v2150_v22  ;;  %v365_v55 = vand.u32 4294901760, %v364_v54  ;;  %v385_v23 = vsub.f32 %v2772_v40, %v384_v63 }
  0xc9   : > { %1777 = vmatprep.subr.bf16.mxu1 %v2398_v43  ;;  %v350_v31 = vand.u32 4294901760, %v349_v21  ;;  %v356_v42 = vand.u32 4294901760, %v355_v36  ;;  %v379_v61 = vsub.f32 %v2765_v47, %v378_v12  ;;  %v3156_v21 = vld [vmem:[#allocation10_spill] sm:$0xff]  ;;  %v371_v22 = vand.u32 4294901760, %v370_v60 }
  0xca   : > { %342 = vmatmul.mubr.f32.vlgmr.msra.gmra.mrb[0].mxu0 %v341_v18  ;;  %v3154_v18 = vpack.c.bf16 %v2168_v28, %v2160_v24  ;;  %v3157_v54 = vpack.c.bf16 %v2181_v33, %v2173_v29  ;;  %v3158_v36 = vpack.c.bf16 %v2238_v6, %v2229_v1  ;;  %v3159_v24 = vld [vmem:[#allocation11_spill] sm:$0xff]  ;;  %v3160_v28 = vld [vmem:[#allocation12_spill] sm:$0xff]  ;;  %v3161_v60 = vpack.c.bf16 %v2257_v38, %v2252_v35 }
  0xcb   : > { %1735 = vmatpush3.bf16.msra.mxu0 %v3153_v4  ;;  %351 = vmatprep.mubr.f32.mxu0 %v350_v31  ;;  %v380_v4 = vand.u32 4294901760, %v379_v61  ;;  %v3162_v29 = vpack.c.bf16 %v2284_v46, %v2267_v13  ;;  %v3163_v33 = vpack.c.bf16 %v2311_v59, %v2295_v20  ;;  %v3164_v1 = vpack.c.bf16 %v2359_v44, %v2354_v34  ;;  %v3172_v46 = vld [vmem:[#allocation8_spill] sm:$0xff]  ;;  %v3173_v20 = vld [vmem:[#allocation14_spill] sm:$0xff]  ;;  %v3177_v34 = vld [vmem:[#allocation15_spill] sm:$0xff] }
  0xcc   : > { %1381 = vmatmul.mubr.msk.f32.gmra.mrb[6].mxu1 %vm185_vm6, %v2020_v16  ;;  %1737 = vmatprep.subr.bf16.mxu0 %v3154_v18  ;;  %v3165_v6 = vpack.c.bf16 %v2380_v11, %v2366_v41  ;;  %v3166_v35 = vpack.c.bf16 %v2410_v37, %v2392_v3  ;;  %v3167_v38 = vpack.c.bf16 %v2436_v56, %v2431_v30  ;;  %v3171_v30 = vand.u32 4294901760, %v2719_v53  ;;  %v3178_v44 = vld [vmem:[#allocation34_spill] sm:$0xff]  ;;  %v3179_v41 = vld [vmem:[#allocation36_spill] sm:$0xff]  ;;  %v3181_v11 = vld [vmem:[#allocation17_spill] sm:$0xff] }
  0xcd   : > { %1779 = vmatpush3.bf16.msra.mxu1 %v3155_v25  ;;  %909 = vmatprep.mubr.f32.mxu1 %v333_v50  ;;  %v3168_v13 = vpack.c.bf16 %v2473_v0, %v2469_v27  ;;  %v3169_v37 = vpack.c.bf16 %v2487_v8, %v2484_v9  ;;  %v3184_v56 = vld [vmem:[#allocation37_spill] sm:$0xff]  ;;  %v3187_v27 = vld [vmem:[#allocation20_spill] sm:$0xff]  ;;  %v3190_v8 = vld [vmem:[#allocation23_spill] sm:$0xff] }
  0xce   : > { %357 = vmatmul.mubr.f32.gmra.mrb[2].mxu0 %v356_v42  ;;  %1781 = vmatprep.subr.bf16.mxu1 %v3156_v21  ;;  %v386_v42 = vand.u32 4294901760, %v385_v23  ;;  %v3188_v0 = vld [vmem:[#allocation21_spill] sm:$0xff] }
  0xcf   : > { %1739 = vmatpush3.bf16.msra.mxu0 %v3157_v54  ;;  %366 = vmatprep.mubr.f32.mxu0 %v365_v55 }
  0xd0   : > { %1741 = vmatprep.subr.bf16.mxu0 %v3158_v36 }
  0xd1   : > { %1783 = vmatpush3.bf16.msra.mxu1 %v3159_v24 }
  0xd2   : > { %372 = vmatmul.mubr.f32.gmra.mrb[4].mxu0 %v371_v22  ;;  %1785 = vmatprep.subr.bf16.mxu1 %v3160_v28 }
  0xd3   : > { %1743 = vmatpush3.bf16.msra.mxu0 %v3161_v60  ;;  %381 = vmatprep.mubr.f32.mxu0 %v380_v4 }
  0xd4   : > { %1745 = vmatprep.subr.bf16.mxu0 %v3162_v29 }
  0xd5   : > { %1787 = vmatpush3.bf16.msra.mxu1 %v2525_v10 }
  0xd6   : > { %387 = vmatmul.mubr.f32.gmra.mrb[6].mxu0 %v386_v42  ;;  %1789 = vmatprep.subr.bf16.mxu1 %v2536_v49 }
  0xd7   : > { %1747 = vmatpush3.bf16.msra.mxu0 %v3163_v33  ;;  %775 = vmatprep.mubr.f32.mxu0 %v2712_v19 }
  0xd8   : > { %1749 = vmatprep.subr.bf16.mxu0 %v3164_v1 }
  0xd9   : > { %1791 = vmatpush3.bf16.msra.mxu1 %v2538_v52 }
  0xda   : > { %1793 = vmatprep.subr.bf16.mxu1 %v2540_v58 }
  0xdb   : > { %1751 = vmatpush3.bf16.msra.mxu0 %v3165_v6 }
  0xdc   : > { %1753 = vmatprep.subr.bf16.mxu0 %v3166_v35 }
  0xdd   : > { %1795 = vmatpush3.bf16.msra.mxu1 %v2545_v2 }
  0xde   : > { %1829 = vmatprep.subr.bf16.mxu1 %v2222_v62  ;;  %v3170_v62 = vpack.c.bf16 %v2506_v32, %v2504_v17  ;;  %v3189_v17 = vld [vmem:[#allocation22_spill] sm:$0xff]  ;;  %v3191_v32 = vld [vmem:[#allocation24_spill] sm:$0xff] }
  0xdf   : > { %1755 = vmatpush3.bf16.msra.mxu0 %v3167_v38 }
  0xe0   : > { %913 = vmatmul.mubr.f32.vlgmr.msra.gmra.mrb[8].mxu1 %v339_v26  ;;  %1757 = vmatprep.subr.bf16.mxu0 %v3168_v13 }
  0xe1   : > { %920 = vmatprep.mubr.f32.mxu1 %v348_v15  ;;  %1831 = vmatpush3.bf16.msra.mxu1 %v2245_v7  ;;  %v3174_v7 = vld [vmem:[#allocation13_spill] sm:$0xff] }
  0xe2   : > { %1833 = vmatprep.subr.bf16.mxu1 %v2273_v39  ;;  %v3175_v59 = vpack.c.bf16 %v3173_v20, %v3174_v7  ;;  %v3176_v39 = vand.u32 4294901760, %v2721_v45 }
  0xe3   : > { %1759 = vmatpush3.bf16.msra.mxu0 %v3169_v37 }
  0xe4   : > { %924 = vmatmul.mubr.f32.gmra.mrb[10].mxu1 %v354_v51  ;;  %1761 = vmatprep.subr.bf16.mxu0 %v3170_v62 }
  0xe5   : > { %931 = vmatprep.mubr.f32.mxu1 %v3171_v30  ;;  %1835 = vmatpush3.bf16.msra.mxu1 %v2324_v14  ;;  %v3180_v14 = vld [vmem:[#allocation16_spill] sm:$0xff] }
  0xe6   : > { %1837 = vmatprep.subr.bf16.mxu1 %v3172_v46 }
  0xe7   : > { %1763 = vmatpush3.bf16.msra.mxu0 %v3175_v59 }
  0xe8   : > { %935 = vmatmul.mubr.f32.gmra.mrb[12].mxu1 %v3176_v39  ;;  %1797 = vmatprep.subr.bf16.mxu0 %v3177_v34 }
  0xe9   : > { %942 = vmatprep.mubr.f32.mxu1 %v378_v12  ;;  %1839 = vmatpush3.bf16.msra.mxu1 %v2372_v57  ;;  %v3185_v57 = vld [vmem:[#allocation18_spill] sm:$0xff] }
  0xea   : > { %778 = vmatmul.mubr.f32.vlgmr.msra.gmra.mrb[8].mxu0 %v3178_v44  ;;  %1841 = vmatprep.subr.bf16.mxu1 %v2398_v43  ;;  %v3186_v43 = vld [vmem:[#allocation19_spill] sm:$0xff] }
  0xeb   : > { %784 = vmatprep.mubr.f32.mxu0 %v3179_v41  ;;  %1799 = vmatpush3.bf16.msra.mxu0 %v3180_v14 }
  0xec   : > { %946 = vmatmul.mubr.f32.gmra.mrb[14].mxu1 %v384_v63  ;;  %1801 = vmatprep.subr.bf16.mxu0 %v3181_v11  ;;  %v3194_v63 = vld [vmem:[#allocation27_spill] sm:$0xff] }
  0xed   : > { %1843 = vmatpush3.bf16.msra.mxu1 %v3155_v25  ;;  %1390 = vmatprep.mubr.msk.f32.mxu1 %vm180_vm1, %v2020_v16 }
  0xee   : > { %787 = vmatmul.mubr.f32.gmra.mrb[10].mxu0 %v3184_v56  ;;  %1845 = vmatprep.subr.bf16.mxu1 %v3156_v21 }
  0xef   : > { %793 = vmatprep.mubr.f32.mxu0 %v2719_v53  ;;  %1803 = vmatpush3.bf16.msra.mxu0 %v3185_v57 }
  0xf0   : > { %1805 = vmatprep.subr.bf16.mxu0 %v3186_v43 }
  0xf1   : > { %1847 = vmatpush3.bf16.msra.mxu1 %v3159_v24 }
  0xf2   : > { %796 = vmatmul.mubr.f32.gmra.mrb[12].mxu0 %v2721_v45  ;;  %1849 = vmatprep.subr.bf16.mxu1 %v3160_v28  ;;  %v3199_v45 = vld [vmem:[#allocation30_spill] sm:$0xff] }
  0xf3   : > { %802 = vmatprep.mubr.f32.mxu0 %v2765_v47  ;;  %1807 = vmatpush3.bf16.msra.mxu0 %v3187_v27 }
  0xf4   : > { %1809 = vmatprep.subr.bf16.mxu0 %v3188_v0 }
  0xf5   : > { %1851 = vmatpush3.bf16.msra.mxu1 %v2525_v10  ;;  %v3192_v10 = vld [vmem:[#allocation25_spill] sm:$0xff] }
  0xf6   : > { %805 = vmatmul.mubr.f32.gmra.mrb[14].mxu0 %v2772_v40  ;;  %1853 = vmatprep.subr.bf16.mxu1 %v2536_v49  ;;  %v3193_v49 = vld [vmem:[#allocation26_spill] sm:$0xff] }
  0xf7   : > { %1811 = vmatpush3.bf16.msra.mxu0 %v3189_v17  ;;  %1382 = vmatprep.mubr.msk.f32.mxu0 %vm180_vm1, %v2020_v16 }
  0xf8   : > { %1813 = vmatprep.subr.bf16.mxu0 %v3190_v8 }
  0xf9   : > { %1855 = vmatpush3.bf16.msra.mxu1 %v2538_v52  ;;  %v3196_v52 = vld [vmem:[#allocation28_spill] sm:$0xff] }
  0xfa   : > { %1857 = vmatprep.subr.bf16.mxu1 %v2540_v58 }
  0xfb   : > { %1815 = vmatpush3.bf16.msra.mxu0 %v3191_v32 }
  0xfc   : > { %1817 = vmatprep.subr.bf16.mxu0 %v3192_v10 }
  0xfd   : > { %1859 = vmatpush3.bf16.msra.mxu1 %v2545_v2  ;;  %v3197_v2 = vld [vmem:[#allocation29_spill] sm:$0xff] }
  0xff   : > { %1819 = vmatpush3.bf16.msra.mxu0 %v3193_v49 }
 0x100   : > { %1391 = vmatmul.mubr.msk.f32.vlgmr.msra.gmra.mrb[16].mxu1 %vm179_vm0, %v2020_v16  ;;  %1821 = vmatprep.subr.bf16.mxu0 %v3194_v63 }
 0x101   : > { %1392 = vmatprep.mubr.msk.f32.mxu1 %vm182_vm5, %v2020_v16 }
 0x103   : > { %1823 = vmatpush3.bf16.msra.mxu0 %v3196_v52 }
 0x104   : > { %1393 = vmatmul.mubr.msk.f32.gmra.mrb[18].mxu1 %vm181_vm4, %v2020_v16  ;;  %1825 = vmatprep.subr.bf16.mxu0 %v3197_v2 }
 0x105   : > { %1394 = vmatprep.mubr.msk.f32.mxu1 %vm184_vm3, %v2020_v16 }
 0x107   : > { %1827 = vmatpush3.bf16.msra.mxu0 %v3199_v45 }
 0x108   : > { %1395 = vmatmul.mubr.msk.f32.gmra.mrb[20].mxu1 %vm183_vm2, %v2020_v16 }
 0x109   : > { %1396 = vmatprep.mubr.msk.f32.mxu1 %vm186_vm7, %v2020_v16 }
 0x10a   : > { %1383 = vmatmul.mubr.msk.f32.vlgmr.msra.gmra.mrb[16].mxu0 %vm179_vm0, %v2020_v16 }
 0x10b   : > { %1384 = vmatprep.mubr.msk.f32.mxu0 %vm182_vm5, %v2020_v16 }
 0x10c   : > { %1397 = vmatmul.mubr.msk.f32.gmra.mrb[22].mxu1 %vm185_vm6, %v2020_v16 }
 0x10e   : > { %1385 = vmatmul.mubr.msk.f32.gmra.mrb[18].mxu0 %vm181_vm4, %v2020_v16 }
 0x10f   : > { %1386 = vmatprep.mubr.msk.f32.mxu0 %vm184_vm3, %v2020_v16 }
 0x112   : > { %1387 = vmatmul.mubr.msk.f32.gmra.mrb[20].mxu0 %vm183_vm2, %v2020_v16 }
 0x113   : > { %1388 = vmatprep.mubr.msk.f32.mxu0 %vm186_vm7, %v2020_v16 }
 0x116   : > { %1389 = vmatmul.mubr.msk.f32.gmra.mrb[22].mxu0 %vm185_vm6, %v2020_v16 }
 0x192   : > { %v1480_v40 = vpop.f32.mrb[0].mxu1 }
 0x193   : > { %v1481_v15 = vpop.f32.mrb[1].mxu1 }
 0x194   : > { %v1482_v61 = vadd.f32 %v1481_v15, %v1480_v40 }
 0x196   : > { %v1483_v19 = vpop.f32.mrb[2].mxu1 }
 0x197   : > { %v1484_v50 = vpop.f32.mrb[3].mxu1 }
 0x198   : > { %v1485_v47 = vadd.f32 %v1484_v50, %v1483_v19 }
 0x19a   : > { %v1486_v26 = vpop.f32.mrb[4].mxu1 }
 0x19b   : > { %v1487_v51 = vpop.f32.mrb[5].mxu1 }
 0x19c   : > { %v1488_v12 = vadd.f32 %v1487_v51, %v1486_v26 }
 0x19d   : > { %v1436_v31 = vpop.f32.mrb[0].mxu0 }
 0x19e   : > { %v1437_v55 = vpop.f32.mrb[1].mxu0 }
 0x19f   : > { %v1438_v18 = vadd.f32 %v1437_v55, %v1436_v31  ;;  %v1489_v25 = vpop.f32.mrb[6].mxu1 }
 0x1a0   : > { %v1490_v21 = vpop.f32.mrb[7].mxu1 }
 0x1a1   : > { %v621_v22 = vadd.f32 %v1482_v61, %v1438_v18  ;;  %v1439_v23 = vpop.f32.mrb[2].mxu0  ;;  %v1491_v54 = vadd.f32 %v1490_v21, %v1489_v25 }
 0x1a2   : > { %v1440_v4 = vpop.f32.mrb[3].mxu0 }
 0x1a3   : > { %v1441_v48 = vadd.f32 %v1440_v4, %v1439_v23 }
 0x1a5   : > { %v628_v5 = vadd.f32 %v1485_v47, %v1441_v48  ;;  %v1442_v16 = vpop.f32.mrb[4].mxu0 }
 0x1a6   : > { %v1443_v36 = vpop.f32.mrb[5].mxu0 }
 0x1a7   : > { %v1444_v24 = vadd.f32 %v1443_v36, %v1442_v16 }
 0x1a9   : > { %v635_v28 = vadd.f32 %v1488_v12, %v1444_v24  ;;  %v1445_v42 = vpop.f32.mrb[6].mxu0 }
 0x1aa   : > { %v1446_v60 = vpop.f32.mrb[7].mxu0 }
 0x1ab   : > { %v1447_v29 = vadd.f32 %v1446_v60, %v1445_v42 }
 0x1ad   : > { %v642_v33 = vadd.f32 %v1491_v54, %v1447_v29 }
 0x1b3   : > { %v1568_v1 = vpop.f32.mrb[8].mxu1 }
 0x1b4   : > { %v1569_v6 = vpop.f32.mrb[9].mxu1 }
 0x1b5   : > { %v1570_v35 = vadd.f32 %v1569_v6, %v1568_v1 }
 0x1b7   : > { %v1571_v38 = vpop.f32.mrb[10].mxu1 }
 0x1b8   : > { %v1572_v13 = vpop.f32.mrb[11].mxu1 }
 0x1b9   : > { %v1573_v37 = vadd.f32 %v1572_v13, %v1571_v38 }
 0x1bb   : > { %v1574_v62 = vpop.f32.mrb[12].mxu1 }
 0x1bc   : > { %v1575_v30 = vpop.f32.mrb[13].mxu1 }
 0x1bd   : > { %v1524_v46 = vpop.f32.mrb[8].mxu0  ;;  %v1576_v20 = vadd.f32 %v1575_v30, %v1574_v62 }
 0x1be   : > { %v1525_v7 = vpop.f32.mrb[9].mxu0 }
 0x1bf   : > { %v1526_v59 = vadd.f32 %v1525_v7, %v1524_v46  ;;  %v1577_v39 = vpop.f32.mrb[14].mxu1 }
 0x1c0   : > { %v1578_v34 = vpop.f32.mrb[15].mxu1 }
 0x1c1   : > { %v780_v44 = vadd.f32 %v1526_v59, %v621_v22  ;;  %v1527_v41 = vpop.f32.mrb[10].mxu0  ;;  %v1579_v14 = vadd.f32 %v1578_v34, %v1577_v39 }
 0x1c2   : > { %v1528_v11 = vpop.f32.mrb[11].mxu0 }
 0x1c3   : > { %v1529_v3 = vadd.f32 %v1528_v11, %v1527_v41  ;;  %v915_v9 = vadd.f32 %v1570_v35, %v780_v44 }
 0x1c5   : > { %v789_v56 = vadd.f32 %v1529_v3, %v628_v5  ;;  %v1530_v57 = vpop.f32.mrb[12].mxu0 }
 0x1c6   : > { %v1531_v43 = vpop.f32.mrb[13].mxu0 }
 0x1c7   : > { %v1532_v27 = vadd.f32 %v1531_v43, %v1530_v57  ;;  %v926_v0 = vadd.f32 %v1573_v37, %v789_v56 }
 0x1c9   : > { %v798_v17 = vadd.f32 %v1532_v27, %v635_v28  ;;  %v1533_v8 = vpop.f32.mrb[14].mxu0 }
 0x1ca   : > { %v1534_v32 = vpop.f32.mrb[15].mxu0 }
 0x1cb   : > { %v1535_v10 = vadd.f32 %v1534_v32, %v1533_v8  ;;  %v937_v49 = vadd.f32 %v1576_v20, %v798_v17 }
 0x1cd   : > { %v807_v63 = vadd.f32 %v1535_v10, %v642_v33 }
 0x1cf   : > { %v948_v53 = vadd.f32 %v1579_v14, %v807_v63 }
 0x1d3   : > { %v1656_v52 = vpop.f32.mrb[16].mxu1 }
 0x1d4   : > { %v1657_v2 = vpop.f32.mrb[17].mxu1 }
 0x1d5   : > { %v1658_v58 = vadd.f32 %v1657_v2, %v1656_v52 }
 0x1d7   : > { %v1659_v45 = vpop.f32.mrb[18].mxu1 }
 0x1d8   : > { %v1660_v40 = vpop.f32.mrb[19].mxu1 }
 0x1d9   : > { %v1661_v15 = vadd.f32 %v1660_v40, %v1659_v45 }
 0x1db   : > { %v1662_v61 = vpop.f32.mrb[20].mxu1 }
 0x1dc   : > { %v1663_v19 = vpop.f32.mrb[21].mxu1 }
 0x1dd   : > { %v1612_v50 = vpop.f32.mrb[16].mxu0  ;;  %v1664_v47 = vadd.f32 %v1663_v19, %v1662_v61 }
 0x1de   : > { %v1613_v26 = vpop.f32.mrb[17].mxu0 }
 0x1df   : > { %v1614_v51 = vadd.f32 %v1613_v26, %v1612_v50  ;;  %v1665_v12 = vpop.f32.mrb[22].mxu1 }
 0x1e0   : > { %v1666_v31 = vpop.f32.mrb[23].mxu1 }
 0x1e1   : > { %v1116_v55 = vadd.f32 %v1614_v51, %v915_v9  ;;  %v1615_v18 = vpop.f32.mrb[18].mxu0  ;;  %v1667_v25 = vadd.f32 %v1666_v31, %v1665_v12 }
 0x1e2   : > { %v1616_v21 = vpop.f32.mrb[19].mxu0 }
 0x1e3   : > { %v1241_v22 = vadd.f32 %v1658_v58, %v1116_v55  ;;  %v1617_v23 = vadd.f32 %v1616_v21, %v1615_v18 }
 0x1e5   : > { %1265 = vst [vmem:[%s152_s25] sm:$0xff] %v1241_v22  ;;  %v1123_v54 = vadd.f32 %v1617_v23, %v926_v0  ;;  %v1618_v4 = vpop.f32.mrb[20].mxu0 }
 0x1e6   : > { %v1619_v48 = vpop.f32.mrb[21].mxu0 }
 0x1e7   : > { %v1248_v5 = vadd.f32 %v1661_v15, %v1123_v54  ;;  %v1620_v16 = vadd.f32 %v1619_v48, %v1618_v4 }
 0x1e9   : > { %1266 = vst [vmem:[%s152_s25 + $0x8] sm:$0xff] %v1248_v5  ;;  %v1130_v36 = vadd.f32 %v1620_v16, %v937_v49  ;;  %v1621_v24 = vpop.f32.mrb[22].mxu0 }
 0x1ea   : > { %v1622_v28 = vpop.f32.mrb[23].mxu0 }
 0x1eb   : > { %v1255_v42 = vadd.f32 %v1664_v47, %v1130_v36  ;;  %v1623_v60 = vadd.f32 %v1622_v28, %v1621_v24 }
 0x1ed   : > { %1267 = vst [vmem:[%s152_s25 + $0x10] sm:$0xff] %v1255_v42  ;;  %v1137_v29 = vadd.f32 %v1623_v60, %v948_v53 }
 0x1ef   : > { %v1262_v33 = vadd.f32 %v1667_v25, %v1137_v29 }
 0x1f1   : > { %1268 = vst [vmem:[%s152_s25 + $0x18] sm:$0xff] %v1262_v33 }
 0x1f2   : > { %1960 = shalt.err (!%p1957_p7)
}
 0x1f3   : > { %s1961_s7 = scalar_lea.hbm %s2973_s30, 512  ;;  %s1965_s16 = scalar_lea.hbm %s3020_s2, 1024 }
 0x1f4   : > { %p1962_p8 = scmp.ne.s32.totalorder %s2973_s30, %s1961_s7  ;;  %p1966_p1 = scmp.lt.u32.totalorder %s2973_s30, %s3020_s2 }
 0x1f5   : > { %p1967_p0 = scmp.lt.u32.totalorder %s1965_s16, %s1961_s7  ;;  %p1969_p6 = scmp.lt.u32.totalorder %s1961_s7, %s2973_s30 }
 0x1f6   : > { %p1963_p11 = pnand %p1962_p8, %p3200_p9 }
 0x1f7   : > { %p1968_p5 = por %p1967_p0, %p1966_p1 }
 0x1f8   : > { %p1964_p13 = pneg %p1963_p11 }
 0x1f9   : > { %p1970_p10 = por %p1969_p6, %p1968_p5 }
 0x1fb   : > { %p1971_p12 = pnand %p1970_p10, %p1964_p13 }
 0x1fd   : > { %1974 = shalt.err (!%p1971_p12)
}
 0x1fe   : > { %s2022_s23 = smov 128   ;;  %s2023_s21 = smov 8  }
 0x1ff   : > { %1864 = dma.vmem_to_hbm [thread:$0]  (%p3200_p9), %s2968_s26, 512, %s2973_s30, %s2977_s3, %s2022_s23, %s2022_s23, %s2023_s21  }
 0x200 PF: > { %p1876_p2 = scmp.ge.s32.totalorder %s2013_s12, 2  ;;  %s1298_s24 = sand.u32 1, %s2001_s9  }
 0x201   : > { %p3201_p3 = scmp.ne.s32.totalorder %s3082_s20, 0  ;;  %s1299_s25 = scalar_lea.sflag [#allocation4], %s1298_s24 }
 0x203   : > { %p1871_p4 = pnand %p1876_p2, %p3201_p3 }
 0x205   : > { %1996 = dma.done.wait (!%p1871_p4), %s1299_s25, 512  }
 0x206   : > { %1998 = vsyncadd (!%p1871_p4), %s1299_s25, 4294966784  ;;  %p13_p7 = scmp.ge.s32.totalorder %s2064_s15, 4   ;;  %s3202_s9 = smov %s2005_s10 }
 0x207   : > { %s3203_s10 = smov %s2009_s11  ;;  %s3204_s11 = smov %s2075_s18 }
 0x208   : > { %s3205_s12 = smov %s2064_s15  ;;  %15 = sbr.rel (!%p13_p7) target bundleno = 4 (0x4), region = 68 }
 0x20f   :  { %1304 = vsyncpa [#allocation3], 1 }
 0x210   :  { %1306 = vsyncpa [#allocation3 + $0x1], 1 }
 0x211   :  { %1307 = vsyncpa [#allocation4], 1 }
 0x212   :  { %1309 = vsyncpa [#allocation4 + $0x1], 1 }

</bundles_post_ra>
